<compile_context>
chip_gen: v7x
topology: tpu7x:2x2x1
jax: 0.10.0
libtpu: 0.0.40
codegen_flags: <defaults>
</compile_context>

<pallas_src>
import jax
import jax.numpy as jnp
from jax.experimental import pallas as pl
from jax.experimental.pallas import tpu as pltpu


# ---------------------------------------------------------------------------
# Kernel bodies
# ---------------------------------------------------------------------------
def _convt_mxu_kernel(x_ref, w_ref, b_ref, o_ref):
    # x_ref: (1, Cin, ts) | w_ref: (8*Cout, Cin) bf16 | b_ref: (8*Cout, 1) f32
    # o_ref: (1, 8*Cout, ts)
    x_bf = x_ref[0].astype(jnp.bfloat16)                                   # no-op if x already bf16
    acc = jnp.dot(w_ref[...], x_bf, preferred_element_type=jnp.float32)    # MXU, f32 acc
    o_ref[0] = (acc + b_ref[...]).astype(o_ref.dtype)                      # lane-dense store


def _make_vpu_mac_kernel(cin):
    # Exact-f32 path: the matmul is a short, statically-unrolled chain of VPU
    # broadcast-MACs (outer products).  Used only when Cin (and the unrolled op
    # count) is small, where the tile is store/DMA bound and the VALU has slack.
    def kernel(x_ref, w_ref, b_ref, o_ref):
        x = x_ref[0]            # (Cin, ts) f32
        w = w_ref[...]          # (8*Cout, Cin) f32
        acc = w[:, 0:1] * x[0:1, :]                              # (8*Cout, ts)
        for ci in range(1, cin):                                 # static unroll, cin <= 32
            acc = acc + w[:, ci:ci + 1] * x[ci:ci + 1, :]
        o_ref[0] = (acc + b_ref[...]).astype(o_ref.dtype)
    return kernel


# ---------------------------------------------------------------------------
# Wrapper
# ---------------------------------------------------------------------------
def _round_up(v, m):
    return ((v + m - 1) // m) * m


def _resident_spec(block_shape):
    """Grid-invariant operand (constant index_map): DMA'd once; single-buffered so it
    does not burn a second VMEM copy (perf review: Buffered(1))."""
    index_map = lambda n, s: (0,) * len(block_shape)
    try:
        return pl.BlockSpec(block_shape, index_map, pipeline_mode=pl.Buffered(1))
    except TypeError:  # BlockSpec without pipeline_mode support
        return pl.BlockSpec(block_shape, index_map)


def conv_transpose3d_k2s2(x, weight, bias, *, max_ts=4096,
                          intermediate_dtype=jnp.bfloat16):
    """x: (N, Cin, D, H, W); weight: (Cin, Cout, 2, 2, 2); bias: (Cout,).

    Returns ConvTranspose3d(k=2, s=2)(x) as (N, Cout, 2D, 2H, 2W) in
    `intermediate_dtype` (bf16 by default; jnp.float32 for strict f32 parity)."""
    N, Cin, D, H, W = x.shape
    Cout = weight.shape[1]
    Co8 = 8 * Cout
    S = D * H * W
    inter_dtype = jnp.dtype(intermediate_dtype)

    # Matmul layout for x is a pure reshape (no HBM transpose pass).
    xm = x.reshape(N, Cin, S)

    in_item = x.dtype.itemsize
    out_item = inter_dtype.itemsize

    # ---------------------------------------------------------------- VMEM plan
    try:  # generation-aware: 128 MiB parts (v5e/v6e) vs 64 MiB per-TC (v7x)
        vmem_cap = int(pltpu.get_tpu_info().vmem_capacity_bytes)
    except Exception:
        vmem_cap = 64 << 20  # conservative fallback
    small_vmem_part = vmem_cap < (96 << 20)            # v7x-class
    vmem_budget = (40 << 20) if small_vmem_part else (96 << 20)
    vmem_ceiling = (52 << 20) if small_vmem_part else (110 << 20)

    def working_set(ts):
        x_blk = Cin * ts * in_item                 # per pipeline buffer
        o_blk = Co8 * ts * out_item
        w_blk = Co8 * max(Cin, 128) * 4            # lane-padded, single-buffered (f32 worst case)
        b_blk = Co8 * 128 * 4                      # lane-padded f32 bias
        tmp = Cin * ts * 2 + Co8 * ts * 4          # in-kernel bf16 x copy + f32 accumulator
        return 2 * (x_blk + o_blk) + w_blk + b_blk + tmp

    # Largest 128-multiple spatial tile that fits the budget; shrink in 128-steps so we
    # don't strand 30-50% of VMEM the way halving does.  ts % 128 == 0 keeps lane-dense
    # (unmasked) stores; only the single ragged cdiv tile gets masked stores.
    ts = min(max_ts, _round_up(S, 128))
    ts = max(128, (ts // 128) * 128)
    while ts > 128 and working_set(ts) > vmem_budget:
        ts -= 128
    if S <= ts:
        ts = S  # single full-extent block along the spatial axis (always legal)

    n_sp = pl.cdiv(S, ts)
    # v7x has two TensorCores: guarantee at least one "parallel" axis with extent >= 2.
    if small_vmem_part and N * n_sp < 2 and S > 256:
        ts = _round_up(pl.cdiv(S, 2), 128)
        n_sp = pl.cdiv(S, ts)

    vmem_limit = int(min(max(working_set(ts) + (8 << 20), 32 << 20), vmem_ceiling))

    # Compute-path selection: exact-f32 VPU MAC when the contraction is tiny and the
    # input is f32 (bounded unroll so compile stays cheap); bf16 MXU otherwise.
    # bf16 inputs are consumed directly — no wrapper-side cast pass (anti-pattern).
    unrolled_vregs = Cin * Co8 * ts // 1024
    use_vpu_exact = (x.dtype == jnp.float32) and (Cin <= 32) and (unrolled_vregs <= 4096)
    w_dtype = jnp.float32 if use_vpu_exact else jnp.bfloat16

    # (Cin, Cout, kd, kh, kw) -> (kd, kh, kw, Cout, Cin) -> (8*Cout, Cin).
    # (For realistic channel counts, keeping Co8 a multiple of 256 matches the v6e/v7x
    #  MXU exactly; mostly HBM-bound so we don't pad Cout here.)
    wm = jnp.transpose(weight, (2, 3, 4, 1, 0)).reshape(Co8, Cin).astype(w_dtype)
    bm = jnp.tile(bias, 8).reshape(Co8, 1).astype(jnp.float32)

    kernel = _make_vpu_mac_kernel(Cin) if use_vpu_exact else _convt_mxu_kernel

    cost = pl.CostEstimate(
        flops=2 * N * Cin * Co8 * S,
        transcendentals=0,
        bytes_accessed=(N * S * (Cin * in_item + Co8 * out_item)
                        + Co8 * Cin * jnp.dtype(w_dtype).itemsize + Co8 * 4),
    )

    # NOTE: the ragged last spatial tile computes on whatever padding Pallas DMA'd in;
    # those columns only land in masked (dropped) output lanes, so it is safe — do not
    # add an in-kernel reduction across the spatial axis without revisiting this.
    grid = (N, n_sp)  # both parallel -> shards across the v7x megacore

    out = pl.pallas_call(
        kernel,
        out_shape=jax.ShapeDtypeStruct((N, Co8, S), inter_dtype),
        grid=grid,
        in_specs=[
            pl.BlockSpec((1, Cin, ts), lambda n, s: (n, 0, s)),
            _resident_spec((Co8, Cin)),   # weight: DMA'd once, single-buffered
            _resident_spec((Co8, 1)),     # bias
        ],
        out_specs=pl.BlockSpec((1, Co8, ts), lambda n, s: (n, 0, s)),
        compiler_params=pltpu.CompilerParams(
            dimension_semantics=("parallel", "parallel"),
            vmem_limit_bytes=vmem_limit,
        ),
        cost_estimate=cost,
    )(xm, wm, bm)

    # (N, kd, kh, kw, Cout, D, H, W) -> (N, Cout, D, kd, H, kh, W, kw) -> NCDHW.
    # TODO(synk): this 8x-volume interleave back to NCDHW (and the concat after it) is
    # the remaining wall-clock dominator; it disappears with a channels-last model
    # layout (or an in-kernel kw interleave via bf16 pair-packing).  The bf16
    # intermediate above already halves its read traffic, the reshape is free, and XLA
    # can fuse the transpose into the concat's copy of x_up.
    y = out.reshape(N, 2, 2, 2, Cout, D, H, W)
    y = jnp.transpose(y, (0, 4, 5, 1, 6, 2, 7, 3))
    return y.reshape(N, Cout, 2 * D, 2 * H, 2 * W)


def up_sample_forward(x, skip, weight, bias, *, intermediate_dtype=jnp.bfloat16):
    """Matches up_sample.forward: upsample x, center-crop skip, concat on channel dim."""
    x_up = conv_transpose3d_k2s2(x, weight, bias, intermediate_dtype=intermediate_dtype)
    D, H, W = x_up.shape[-3:]
    sD, sH, sW = skip.shape[-3:]
    dl = (sD - D) // 2
    hl = (sH - H) // 2
    wl = (sW - W) // 2
    skip_crop = skip[:, :, dl:dl + D, hl:hl + H, wl:wl + W]
    # bf16 x_up + f32 skip promotes back to f32 (matching the module's dtype); under
    # jit the promote + permute fuse into the concat's copy of x_up.
    return jnp.concatenate([x_up, skip_crop], axis=1)


def _reference(x, skip, weight, bias):
    # Pure-JAX f32 reference of ConvTranspose3d(k=2, s=2) via the scatter identity.
    N, Cin, D, H, W = x.shape
    Cout = weight.shape[1]
    y = jnp.einsum("ncdhw,coijk->nodihjwk", x, weight,
                   precision=jax.lax.Precision.HIGHEST)
    y = y.reshape(N, Cout, 2 * D, 2 * H, 2 * W) + bias[None, :, None, None, None]
    Dh, Hh, Wh = y.shape[-3:]
    sD, sH, sW = skip.shape[-3:]
    dl, hl, wl = (sD - Dh) // 2, (sH - Hh) // 2, (sW - Wh) // 2
    skip_crop = skip[:, :, dl:dl + Dh, hl:hl + Hh, wl:wl + Wh]
    return jnp.concatenate([y, skip_crop], axis=1)


if __name__ == "__main__":
    key = jax.random.PRNGKey(0)
    k_x, k_s, k_w, k_b, k_x2, k_s2, k_w2, k_b2 = jax.random.split(key, 8)

    # --- small-Cin shapes (exact-f32 VPU path, bf16 intermediate by default) ------
    N, ch_in, ch_out = 2, 4, 3
    D = H = W = 4                      # x_up will be (2, 3, 8, 8, 8)
    x = jax.random.normal(k_x, (N, ch_in, D, H, W), dtype=jnp.float32)
    skip = jax.random.normal(k_s, (N, ch_out, 10, 10, 10), dtype=jnp.float32)
    weight = 0.1 * jax.random.normal(k_w, (ch_in, ch_out, 2, 2, 2), dtype=jnp.float32)
    bias = 0.1 * jax.random.normal(k_b, (ch_out,), dtype=jnp.float32)

    ref = _reference(x, skip, weight, bias)

    up = jax.jit(up_sample_forward)
    out = up(x, skip, weight, bias)
    jax.block_until_ready(out)
    assert out.shape == (N, 2 * ch_out, 2 * D, 2 * H, 2 * W), out.shape
    assert out.dtype == jnp.float32, out.dtype
    # exact-f32 compute; only error is the single bf16 rounding of the intermediate.
    assert jnp.allclose(out, ref, atol=1e-2, rtol=1e-2), float(jnp.max(jnp.abs(out - ref)))

    # --- strict f32 parity path (intermediate_dtype override) ---------------------
    up_f32 = jax.jit(lambda a, s, w, b: up_sample_forward(
        a, s, w, b, intermediate_dtype=jnp.float32))
    out_f32 = up_f32(x, skip, weight, bias)
    jax.block_until_ready(out_f32)
    assert jnp.allclose(out_f32, ref, atol=1e-4, rtol=1e-4), \
        float(jnp.max(jnp.abs(out_f32 - ref)))

    # --- larger Cin exercises the bf16 MXU path ------------------------------------
    ch_in2, ch_out2 = 64, 8
    x2 = jax.random.normal(k_x2, (N, ch_in2, D, H, W), dtype=jnp.float32)
    skip2 = jax.random.normal(k_s2, (N, ch_out2, 10, 10, 10), dtype=jnp.float32)
    weight2 = 0.1 * jax.random.normal(k_w2, (ch_in2, ch_out2, 2, 2, 2), dtype=jnp.float32)
    bias2 = 0.1 * jax.random.normal(k_b2, (ch_out2,), dtype=jnp.float32)
    out2 = up(x2, skip2, weight2, bias2)
    jax.block_until_ready(out2)
    ref2 = _reference(x2, skip2, weight2, bias2)
    assert jnp.allclose(out2, ref2, atol=3e-2, rtol=3e-2), \
        float(jnp.max(jnp.abs(out2 - ref2)))

    print("KERNEL_OK")
</pallas_src>

<mosaic_0001>
module attributes {stable_mosaic.version = 11 : i64} {
  func.func @kernel(%arg0: i32, %arg1: i32, %arg2: memref<1x4x64xf32, #tpu.memory_space<vmem>>, %arg3: memref<24x4xf32, #tpu.memory_space<vmem>>, %arg4: memref<24x1xf32, #tpu.memory_space<vmem>>, %arg5: memref<1x24x64xbf16, #tpu.memory_space<vmem>>) attributes {dimension_semantics = [#tpu.dimension_semantics<parallel>, #tpu.dimension_semantics<parallel>], iteration_bounds = array<i64: 2, 1>, scalar_prefetch = 0 : i64, scratch_operands = 0 : i64, tpu.core_type = #tpu.core_type<tc>, window_params = [{transform_indices = @transform_0, window_bounds = array<i64: 1, 4, 64>}, {pipeline_mode = #tpu.pipeline_mode<synchronous>, transform_indices = @transform_1, window_bounds = array<i64: 24, 4>}, {pipeline_mode = #tpu.pipeline_mode<synchronous>, transform_indices = @transform_2, window_bounds = array<i64: 24, 1>}, {transform_indices = @transform_3, window_bounds = array<i64: 1, 24, 64>}]} {
    %c0 = arith.constant 0 : index
    %c0_0 = arith.constant 0 : index
    %c0_1 = arith.constant 0 : index
    %0 = vector.load %arg2[%c0, %c0_0, %c0_1] : memref<1x4x64xf32, #tpu.memory_space<vmem>>, vector<1x4x64xf32>
    %1 = vector.shape_cast %0 : vector<1x4x64xf32> to vector<4x64xf32>
    %c0_2 = arith.constant 0 : index
    %c0_3 = arith.constant 0 : index
    %2 = vector.load %arg3[%c0_2, %c0_3] : memref<24x4xf32, #tpu.memory_space<vmem>>, vector<24x4xf32>
    %3 = vector.extract_strided_slice %2 {offsets = [0, 0], sizes = [24, 1], strides = [1, 1]} : vector<24x4xf32> to vector<24x1xf32>
    %4 = vector.extract_strided_slice %1 {offsets = [0, 0], sizes = [1, 64], strides = [1, 1]} : vector<4x64xf32> to vector<1x64xf32>
    %5 = vector.broadcast %3 : vector<24x1xf32> to vector<24x64xf32>
    %6 = vector.broadcast %4 : vector<1x64xf32> to vector<24x64xf32>
    %7 = arith.mulf %5, %6 : vector<24x64xf32>
    %8 = vector.extract_strided_slice %2 {offsets = [0, 1], sizes = [24, 1], strides = [1, 1]} : vector<24x4xf32> to vector<24x1xf32>
    %9 = vector.extract_strided_slice %1 {offsets = [1, 0], sizes = [1, 64], strides = [1, 1]} : vector<4x64xf32> to vector<1x64xf32>
    %10 = vector.broadcast %8 : vector<24x1xf32> to vector<24x64xf32>
    %11 = vector.broadcast %9 : vector<1x64xf32> to vector<24x64xf32>
    %12 = arith.mulf %10, %11 : vector<24x64xf32>
    %13 = arith.addf %7, %12 : vector<24x64xf32>
    %14 = vector.extract_strided_slice %2 {offsets = [0, 2], sizes = [24, 1], strides = [1, 1]} : vector<24x4xf32> to vector<24x1xf32>
    %15 = vector.extract_strided_slice %1 {offsets = [2, 0], sizes = [1, 64], strides = [1, 1]} : vector<4x64xf32> to vector<1x64xf32>
    %16 = vector.broadcast %14 : vector<24x1xf32> to vector<24x64xf32>
    %17 = vector.broadcast %15 : vector<1x64xf32> to vector<24x64xf32>
    %18 = arith.mulf %16, %17 : vector<24x64xf32>
    %19 = arith.addf %13, %18 : vector<24x64xf32>
    %20 = vector.extract_strided_slice %2 {offsets = [0, 3], sizes = [24, 1], strides = [1, 1]} : vector<24x4xf32> to vector<24x1xf32>
    %21 = vector.extract_strided_slice %1 {offsets = [3, 0], sizes = [1, 64], strides = [1, 1]} : vector<4x64xf32> to vector<1x64xf32>
    %22 = vector.broadcast %20 : vector<24x1xf32> to vector<24x64xf32>
    %23 = vector.broadcast %21 : vector<1x64xf32> to vector<24x64xf32>
    %24 = arith.mulf %22, %23 : vector<24x64xf32>
    %25 = arith.addf %19, %24 : vector<24x64xf32>
    %c0_4 = arith.constant 0 : index
    %c0_5 = arith.constant 0 : index
    %26 = vector.load %arg4[%c0_4, %c0_5] : memref<24x1xf32, #tpu.memory_space<vmem>>, vector<24x1xf32>
    %27 = vector.broadcast %26 : vector<24x1xf32> to vector<24x64xf32>
    %28 = arith.addf %25, %27 : vector<24x64xf32>
    %29 = arith.truncf %28 : vector<24x64xf32> to vector<24x64xbf16>
    %c0_6 = arith.constant 0 : index
    %c0_7 = arith.constant 0 : index
    %c0_8 = arith.constant 0 : index
    %30 = vector.load %arg5[%c0_6, %c0_7, %c0_8] : memref<1x24x64xbf16, #tpu.memory_space<vmem>>, vector<1x24x64xbf16>
    %31 = vector.shape_cast %30 : vector<1x24x64xbf16> to vector<24x64xbf16>
    %32 = vector.shape_cast %29 : vector<24x64xbf16> to vector<1x24x64xbf16>
    tpu.vector_store %arg5[%c0_6, %c0_7, %c0_8], %32 {strides = array<i32>} : memref<1x24x64xbf16, #tpu.memory_space<vmem>>, vector<1x24x64xbf16>,
    return
  }
  func.func @transform_0(%arg0: i32, %arg1: i32) -> (i32, i32, i32) {
    %c0_i32 = arith.constant 0 : i32
    %c0_i32_0 = arith.constant 0 : i32
    return %arg0, %c0_i32, %arg1 : i32, i32, i32
  }
  func.func @transform_1(%arg0: i32, %arg1: i32) -> (i32, i32) {
    %c0_i32 = arith.constant 0 : i32
    %c0_i32_0 = arith.constant 0 : i32
    %c0_i32_1 = arith.constant 0 : i32
    return %c0_i32, %c0_i32_0 : i32, i32
  }
  func.func @transform_2(%arg0: i32, %arg1: i32) -> (i32, i32) {
    %c0_i32 = arith.constant 0 : i32
    %c0_i32_0 = arith.constant 0 : i32
    %c0_i32_1 = arith.constant 0 : i32
    return %c0_i32, %c0_i32_0 : i32, i32
  }
  func.func @transform_3(%arg0: i32, %arg1: i32) -> (i32, i32, i32) {
    %c0_i32 = arith.constant 0 : i32
    %c0_i32_0 = arith.constant 0 : i32
    return %arg0, %c0_i32, %arg1 : i32, i32, i32
  }
}

</mosaic_0001>

<bundles_post_ra>
// kernel: tile.8
= control target key start
LH: loop header
LB: loop body
LE: loop exit
PB: predicated region body
PF: predicated region fallthrough
CT: control target
= control target key end

     0   :  { %s22_s0 = inlined_call_operand.vmem [shape: f32[3], index: 0, kind: input, shape index: {}]   ;;  %s23_s1 = inlined_call_operand.vmem [shape: f32[8,3], index: 1, kind: output, shape index: {}]  }
   0x1   :  { %v4_v0 = vld [vmem:[%s22_s0] ss:$0 sm:$0xff] }
   0x2   :  { %5 = vst [vmem:[%s23_s1] sm:$0xff] %v4_v0 }

// kernel: tile.0
= control target key start
LH: loop header
LB: loop body
LE: loop exit
PB: predicated region body
PF: predicated region fallthrough
CT: control target
= control target key end

     0   :  { %vm3_vm0 = vcmask 7168   ;;  %s22_s10 = smov 126   ;;  %s45_s0 = inlined_call_operand.vmem [shape: f32[8,3], index: 0, kind: input, shape index: {}]   ;;  %s46_s1 = inlined_call_operand.vmem [shape: f32[24,1], index: 1, kind: output, shape index: {}]  }
   0x1   :  { %v5_v0 = vld [vmem:[%s45_s0] sm:$0xff]   ;;  %s21_s0 = smov 127  }
   0x2   :  { %6 = vrot.lane.b32.xlu0 %v5_v0, %s21_s0  ;;  %4 = vst.msk [vmem:[%s46_s1] ss:$3 sm:$0xff] %vm3_vm0, %v5_v0  }
   0x6   :  { %12 = vrot.lane.b32.xlu0 %v5_v0, %s22_s10 }
  0x74   :  { %v7_v1 = vpop.permute.xlu0 %6  }
  0x75   :  { %17 = vst.msk [vmem:[%s46_s1 + $0x1] ss:$3 sm:$0xff] %vm3_vm0, %v7_v1  }
  0x78   :  { %v13_v2 = vpop.permute.xlu0 %12  }
  0x79   :  { %18 = vst.msk [vmem:[%s46_s1 + $0x2] ss:$3 sm:$0xff] %vm3_vm0, %v13_v2  }

// kernel: up_sample_forward.1
= control target key start
LH: loop header
LB: loop body
LE: loop exit
PB: predicated region body
PF: predicated region fallthrough
CT: control target
= control target key end

     0   :  { %s511_s12 = smov 0   ;;  %s513_s13 = smov 0   ;;  %s573_s0 = inlined_call_operand.vmem [shape: f32[2,4,64], index: 0, kind: input, shape index: {}]   ;;  %s574_s1 = inlined_call_operand.vmem [shape: f32[24,4], index: 1, kind: input, shape index: {}]   ;;  %s575_s2 = inlined_call_operand.vmem [shape: f32[24,1], index: 2, kind: input, shape index: {}]   ;;  %s576_s3 = inlined_call_operand.vmem [shape: bf16[2,24,64], index: 3, kind: output, shape index: {}]  }
   0x1   :  { %s515_s14 = smov 0  }
   0x2 LB: > { %s25_s15 = sadd.s32 1, %s481_s13  ;;  %p413_p0 = scmp.ge.s32.totalorder %s485_s14, 1  ;;  %s485_s14 = sphi %s515_s14, %s13_s14   ;;  %s481_s13 = sphi %s513_s13, %s578_s13   ;;  %s477_s12 = sphi %s511_s12, %s577_s12  }
   0x3   : > { %p27_p1 = scmp.ge.s32.totalorder %s25_s15, 2  ;;  %p155_p2 = scmp.lt.s32.totalorder %s485_s14, 3 }
   0x5   : > { %s580_s15 = smov (%p27_p1, %s25_s15), 0  ;;  %p156_p3 = pnand %p413_p0, %p155_p2 }
   0x6   : > { %v202_v0 = vld [vmem:[%s574_s1 + $0x10] sm:$0xff] (!%p156_p3)  ;;  %v200_v1 = vld [vmem:[%s574_s1] sm:$0xff] (!%p156_p3)  ;;  %v487_v2 = vmov (!%p156_p3), 0   ;;  %v201_v3 = vld [vmem:[%s574_s1 + $0x8] sm:$0xff] (!%p156_p3)  ;;  %v488_v4 = vmov (!%p156_p3), 1   ;;  %v489_v5 = vmov (!%p156_p3), 2   ;;  %v218_v10 = vlaneseq (!%p156_p3) }
   0x7   : > { %159 = sbr.rel (%p156_p3) target bundleno = 177 (0xb1), region = 32  ;;  %454 = vset.pattern.permute.xlu1 (!%p156_p3), %v487_v2  ;;  %453 = vset.pattern.permute.xlu0 (!%p156_p3), %v487_v2  ;;  %v490_v6 = vmov (!%p156_p3), 3   ;;  %v292_v7 = vld [vmem:[%s575_s2 + $0x8] sm:$0xff] (!%p156_p3)  ;;  %v291_v8 = vld [vmem:[%s575_s2] sm:$0xff] (!%p156_p3)  ;;  %v293_v9 = vld [vmem:[%s575_s2 + $0x10] sm:$0xff] (!%p156_p3)  ;;  %p184_p4 = scmp.lt.s32.totalorder (!%p156_p3), %s477_s12, 1 }
   0x8   : > { %215 = vperm.xlu1 (!%p156_p3), %454, %v202_v0   ;;  %205 = vperm.xlu0 (!%p156_p3), %453, %v200_v1   ;;  %v219_v13 = vshrl.u32 (!%p156_p3), %v218_v10, 7  ;;  %vm325_vm0 = vcmask (!%p156_p3), 519168  }
   0xa   : > { %v220_v16 = vsub.s32 (!%p156_p3), 0, %v219_v13  ;;  %v239_v17 = vsub.s32 (!%p156_p3), 1, %v219_v13  ;;  %v261_v19 = vsub.s32 (!%p156_p3), 2, %v219_v13  ;;  %v283_v27 = vsub.s32 (!%p156_p3), 3, %v219_v13 }
   0xc   : > { %455 = vset.pattern.permute.xlu1 (!%p156_p3), %v488_v4  ;;  %210 = vperm.xlu0 (!%p156_p3), %453, %v201_v3  }
   0xd   : > { %226 = vperm.xlu1 (!%p156_p3), %455, %v200_v1  }
   0xe   : > { %s582_s12 = smov (!%p184_p4, %s477_s12), 1 }
   0xf   : > { %s414_s28 = sshll.u32 %s582_s12, 2  ;;  %s424_s5 = smul.u32 12, %s582_s12 }
  0x10   : > { %456 = vset.pattern.permute.xlu0 %v488_v4  ;;  %s190_s4 = scalar_lea.vmem %s573_s0, %s414_s28 }
  0x11   : > { %234 = vperm.xlu1 %455, %v202_v0   ;;  %230 = vperm.xlu0 %456, %v201_v3   ;;  %v199_v18 = vld [vmem:[%s190_s4] sm:$0xf]  ;;  %s198_s8 = scalar_lea.vmem %s576_s3, %s424_s5 }
  0x12   : > { %v221_v22 = vrot.slane %v199_v18, %v220_v16  ;;  %v240_v23 = vrot.slane %v199_v18, %v239_v17  ;;  %v262_v26 = vrot.slane %v199_v18, %v261_v19  ;;  %v284_v32 = vrot.slane %v199_v18, %v283_v27 }
  0x15   : > { %457 = vset.pattern.permute.xlu1 %v489_v5  ;;  %458 = vset.pattern.permute.xlu0 %v489_v5 }
  0x16   : > { %248 = vperm.xlu1 %457, %v200_v1   ;;  %252 = vperm.xlu0 %458, %v201_v3  }
  0x1a   : > { %256 = vperm.xlu1 %457, %v202_v0   ;;  %460 = vset.pattern.permute.xlu0 %v490_v6 }
  0x1b   : > { %274 = vperm.xlu0 %460, %v201_v3  }
  0x1e   : > { %459 = vset.pattern.permute.xlu1 %v490_v6 }
  0x1f   : > { %270 = vperm.xlu1 %459, %v200_v1   ;;  %462 = vset.pattern.permute.xlu0 %v487_v2 }
  0x20   : > { %301 = vperm.xlu0 %462, %v292_v7  }
  0x23   : > { %278 = vperm.xlu1 %459, %v202_v0  }
  0x27   : > { %461 = vset.pattern.permute.xlu1 %v487_v2 }
  0x28   : > { %296 = vperm.xlu1 %461, %v291_v8  }
  0x2c   : > { %306 = vperm.xlu1 %461, %v293_v9  }
  0x87   : > { %v216_v11 = vpop.permute.xlu1 %215  ;;  %v206_v12 = vpop.permute.xlu0 %205 }
  0x88   : > { %v222_v38 = vmul.f32 %v221_v22, %v206_v12  ;;  %v224_v49 = vmul.f32 %v221_v22, %v216_v11 }
  0x8b   : > { %v211_v14 = vpop.permute.xlu0 %210 }
  0x8c   : > { %v227_v15 = vpop.permute.xlu1 %226  ;;  %v223_v24 = vmul.f32 %v221_v22, %v211_v14 }
  0x8d   : > { %v241_v39 = vmul.f32 %v240_v23, %v227_v15 }
  0x8f   : > { %v244_v44 = vadd.f32 %v241_v39, %v222_v38 }
  0x90   : > { %v235_v20 = vpop.permute.xlu1 %234  ;;  %v231_v21 = vpop.permute.xlu0 %230 }
  0x91   : > { %v242_v25 = vmul.f32 %v240_v23, %v231_v21  ;;  %v243_v45 = vmul.f32 %v240_v23, %v235_v20 }
  0x93   : > { %v245_v30 = vadd.f32 %v242_v25, %v223_v24  ;;  %v246_v52 = vadd.f32 %v243_v45, %v224_v49 }
  0x95   : > { %v249_v28 = vpop.permute.xlu1 %248  ;;  %v253_v29 = vpop.permute.xlu0 %252 }
  0x96   : > { %v264_v31 = vmul.f32 %v262_v26, %v253_v29  ;;  %v263_v42 = vmul.f32 %v262_v26, %v249_v28 }
  0x98   : > { %v267_v35 = vadd.f32 %v264_v31, %v245_v30  ;;  %v266_v50 = vadd.f32 %v263_v42, %v244_v44 }
  0x99   : > { %v257_v33 = vpop.permute.xlu1 %256 }
  0x9a   : > { %v275_v34 = vpop.permute.xlu0 %274  ;;  %v265_v51 = vmul.f32 %v262_v26, %v257_v33 }
  0x9b   : > { %v286_v36 = vmul.f32 %v284_v32, %v275_v34 }
  0x9c   : > { %v268_v56 = vadd.f32 %v265_v51, %v246_v52 }
  0x9d   : > { %v289_v37 = vadd.f32 %v286_v36, %v267_v35 }
  0x9e   : > { %v271_v40 = vpop.permute.xlu1 %270 }
  0x9f   : > { %v302_v41 = vpop.permute.xlu0 %301  ;;  %v285_v46 = vmul.f32 %v284_v32, %v271_v40 }
  0xa0   : > { %v310_v43 = vadd.f32 %v302_v41, %v289_v37 }
  0xa1   : > { %v288_v54 = vadd.f32 %v285_v46, %v266_v50 }
  0xa2   : > { %v422_v47 = vpack.c.bf16 %v310_v43, %v310_v43  ;;  %v279_v48 = vpop.permute.xlu1 %278 }
  0xa3   : > { %v287_v53 = vmul.f32 %v284_v32, %v279_v48 }
  0xa4   : > { %327 = vst.msk [vmem:[%s198_s8 + $0x4] sm:$0xf] %vm325_vm0, %v422_v47 }
  0xa5   : > { %v290_v59 = vadd.f32 %v287_v53, %v268_v56 }
  0xa7   : > { %v297_v55 = vpop.permute.xlu1 %296 }
  0xa8   : > { %v309_v57 = vadd.f32 %v297_v55, %v288_v54 }
  0xaa   : > { %v421_v58 = vpack.c.bf16 %v309_v57, %v309_v57 }
  0xab   : > { %v307_v60 = vpop.permute.xlu1 %306 }
  0xac   : > { %326 = vst.msk [vmem:[%s198_s8] sm:$0xf] %vm325_vm0, %v421_v58  ;;  %v311_v61 = vadd.f32 %v307_v60, %v290_v59 }
  0xae   : > { %v423_v62 = vpack.c.bf16 %v311_v61, %v311_v61 }
  0xb0   : > { %328 = vst.msk [vmem:[%s198_s8 + $0x8] sm:$0xf] %vm325_vm0, %v423_v62 }
  0xb1 PF: > { %s13_s14 = sadd.s32 1, %s485_s14   ;;  %s577_s12 = smov %s481_s13 }
  0xb2   : > { %p10_p5 = scmp.ge.s32.totalorder %s13_s14, 4   ;;  %s578_s13 = smov %s580_s15 }
  0xb4   :  { %12 = sbr.rel (!%p10_p5) target bundleno = 2 (0x2), region = 62 }

</bundles_post_ra>
